<compile_context>
chip_gen: v7x
topology: tpu7x:2x2x1
jax: 0.10.0
libtpu: 0.0.40
codegen_flags: <defaults>
</compile_context>

<pallas_src>
from functools import partial

import jax
import jax.numpy as jnp
from jax import lax
from jax.experimental import pallas as pl
from jax.experimental.pallas import tpu as pltpu


C_PAD = 128   # lane-dense padded logits width; sliced back to C outside the kernel
B_PAD = 8     # batch padded to one full sublane tile inside the kernel


def _rup8(n):
    return (n + 7) // 8 * 8


def rnn_classify_kernel(tok_ref, slab_ref, out_ref, *, V_PAD, D, R_WHH, R_WCLS, R_BCLS):
    """Fused (folded) embedding+input projection, tanh RNN recurrence, classifier.

    tok_ref  : (B, T)      int32, SMEM   raw token ids (scalar reads)
    slab_ref : (ROWS, 128) f32,   VMEM   packed parameter slab:
                 rows [0, V_PAD)        cols [0, D)   emb @ W_ih^T + (b_ih + b_hh)
                 rows [R_WHH, +D)       cols [0, D)   W_hh^T
                 rows [R_WCLS, +D)      cols [0, 128) W_cls^T (zero-padded lanes)
                 rows [R_BCLS, +8)      cols [0, 128) b_cls replicated over 8 rows
    out_ref  : (B_PAD, 128) f32,  VMEM   padded logits (lane-dense store)
    """
    B, T = tok_ref.shape
    BP = out_ref.shape[0]

    emb_b = slab_ref[0:V_PAD, 0:D]                 # (V_PAD, D) folded emb proj + bias
    whh = slab_ref[R_WHH:R_WHH + D, 0:D]           # (D, D)
    wcls = slab_ref[R_WCLS:R_WCLS + D, :]          # (D, 128)
    bcls = slab_ref[R_BCLS:R_BCLS + BP, :]         # (BP, 128)

    # Time-major one-hot row selector built from SMEM scalar token reads.
    # Row r = t*B_PAD + b.  Padding rows (b >= B) stay all-zero -> zero pre, zero h.
    # NOTE: out-of-range ids silently produce an all-zero row (PyTorch would
    # error); validate token ids upstream if inputs are untrusted.
    TB = T * BP
    row_iota = lax.broadcasted_iota(jnp.int32, (TB, V_PAD), 0)
    col_iota = lax.broadcasted_iota(jnp.int32, (TB, V_PAD), 1)
    sel = jnp.zeros((TB, V_PAD), jnp.bool_)
    for t in range(T):
        for b in range(B):
            sel = sel | ((row_iota == (t * BP + b)) & (col_iota == tok_ref[b, t]))

    # ONE matmul for every timestep's input projection; bias already folded in.
    pre_all = jnp.dot(sel.astype(jnp.float32), emb_b,
                      preferred_element_type=jnp.float32)          # (T*BP, D)

    h = jnp.zeros((BP, D), jnp.float32)
    for t in range(T):  # static unroll; T is small and known at trace time
        pre_t = pre_all[t * BP:(t + 1) * BP, :]                     # aligned (8, D) tile
        h = jnp.tanh(jnp.dot(h, whh, preferred_element_type=jnp.float32) + pre_t)

    # Classifier epilogue on the padded (lane-dense) output.
    out_ref[...] = (jnp.dot(h, wcls, preferred_element_type=jnp.float32)
                    + bcls).astype(out_ref.dtype)


def torch_model_forward(tokens, params, labels=None):
    """tokens: (B, T) int32. Returns logits (B, C) or, if labels given, the
    mean cross-entropy loss (matching nn.CrossEntropyLoss)."""
    slab = params["slab"]
    C = params["num_classes"]
    layout = params["layout"]

    B, T = tokens.shape
    assert B <= B_PAD, "TODO(synk): add a batch-parallel grid for B > 8"

    kernel = partial(rnn_classify_kernel, **layout)
    logits_padded = pl.pallas_call(
        kernel,
        out_shape=jax.ShapeDtypeStruct((B_PAD, C_PAD), jnp.float32),
        in_specs=[
            pl.BlockSpec(memory_space=pltpu.MemorySpace.SMEM),   # token ids
            pl.BlockSpec(memory_space=pltpu.MemorySpace.VMEM),   # parameter slab
        ],
        out_specs=pl.BlockSpec(memory_space=pltpu.MemorySpace.VMEM),
    )(tokens.astype(jnp.int32), slab)

    y_pred = logits_padded[:B, :C]
    if labels is not None:
        # nn.CrossEntropyLoss (mean reduction) from the kernel logits, plain JAX.
        logz = jax.nn.logsumexp(y_pred, axis=-1)
        picked = jnp.take_along_axis(
            y_pred, labels[:, None].astype(jnp.int32), axis=-1)[:, 0]
        return jnp.mean(logz - picked)
    return y_pred


def init_params(key, vocab_size, vector_dim, sentence_length):
    """Deterministic synthetic parameters matching the nn.Module shapes, packed
    into a single lane-dense (ROWS, 128) f32 slab (one VMEM operand)."""
    k = jax.random.split(key, 7)
    V, D = vocab_size, vector_dim
    C = sentence_length + 1
    scale = 0.1
    emb = scale * jax.random.normal(k[0], (V, D), jnp.float32)
    w_ih = scale * jax.random.normal(k[1], (D, D), jnp.float32)   # PyTorch: (hidden, input)
    w_hh = scale * jax.random.normal(k[2], (D, D), jnp.float32)   # PyTorch: (hidden, hidden)
    b_ih = scale * jax.random.normal(k[3], (D,), jnp.float32)
    b_hh = scale * jax.random.normal(k[4], (D,), jnp.float32)
    w_cls = scale * jax.random.normal(k[5], (C, D), jnp.float32)  # PyTorch: (out, in)
    b_cls = scale * jax.random.normal(k[6], (C,), jnp.float32)

    # Offline algebraic fold: per-token input projection + both RNN biases.
    # onehot @ (emb @ W_ih^T + b) is bit-identical to (onehot @ emb) @ W_ih^T + b.
    emb_b = emb @ w_ih.T + (b_ih + b_hh)[None, :]                 # (V, D)

    V_PAD = _rup8(V)
    R_WHH = V_PAD
    R_WCLS = R_WHH + _rup8(D)
    R_BCLS = R_WCLS + _rup8(D)
    ROWS = R_BCLS + 8

    slab = jnp.zeros((ROWS, C_PAD), jnp.float32)
    slab = slab.at[0:V, 0:D].set(emb_b)
    slab = slab.at[R_WHH:R_WHH + D, 0:D].set(w_hh.T)
    slab = slab.at[R_WCLS:R_WCLS + D, 0:C].set(w_cls.T)
    slab = slab.at[R_BCLS:R_BCLS + 8, 0:C].set(jnp.broadcast_to(b_cls, (8, C)))

    return {
        "slab": slab,
        "num_classes": C,
        "layout": dict(V_PAD=V_PAD, D=D, R_WHH=R_WHH, R_WCLS=R_WCLS, R_BCLS=R_BCLS),
    }


if __name__ == "__main__":
    vocab_size = 10          # len(vocab)
    vector_dim = 32
    sentence_length = 8
    batch = 2

    key = jax.random.PRNGKey(0)
    pkey, xkey, ykey = jax.random.split(key, 3)
    params = init_params(pkey, vocab_size, vector_dim, sentence_length)

    tokens = jax.random.randint(
        xkey, (batch, sentence_length), 0, vocab_size, dtype=jnp.int32
    )

    # Inference path (y=None): logits.
    y_pred = torch_model_forward(tokens, params)
    jax.block_until_ready(y_pred)
    assert y_pred.shape == (batch, sentence_length + 1)
    assert y_pred.dtype == jnp.float32

    # Training path (y given): cross-entropy loss from the kernel logits.
    labels = jax.random.randint(
        ykey, (batch,), 0, sentence_length + 1, dtype=jnp.int32
    )
    loss = torch_model_forward(tokens, params, labels)
    jax.block_until_ready(loss)
    assert loss.shape == ()

    print("KERNEL_OK")
</pallas_src>

<mosaic_0001>
module attributes {stable_mosaic.version = 11 : i64} {
  func.func @rnn_classify_kernel(%arg0: memref<2x8xi32, #tpu.memory_space<smem>>, %arg1: memref<88x128xf32, #tpu.memory_space<vmem>>, %arg2: memref<8x128xf32, #tpu.memory_space<vmem>>) attributes {dimension_semantics = [], scalar_prefetch = 0 : i64, scratch_operands = 0 : i64, tpu.core_type = #tpu.core_type<tc>} {
    %c0 = arith.constant 0 : index
    %c0_0 = arith.constant 0 : index
    %0 = vector.load %arg1[%c0, %c0_0] : memref<88x128xf32, #tpu.memory_space<vmem>>, vector<16x32xf32>
    %c16 = arith.constant 16 : index
    %c0_1 = arith.constant 0 : index
    %1 = vector.load %arg1[%c16, %c0_1] : memref<88x128xf32, #tpu.memory_space<vmem>>, vector<32x32xf32>
    %c48 = arith.constant 48 : index
    %c0_2 = arith.constant 0 : index
    %2 = vector.load %arg1[%c48, %c0_2] : memref<88x128xf32, #tpu.memory_space<vmem>>, vector<32x128xf32>
    %c80 = arith.constant 80 : index
    %c0_3 = arith.constant 0 : index
    %3 = vector.load %arg1[%c80, %c0_3] : memref<88x128xf32, #tpu.memory_space<vmem>>, vector<8x128xf32>
    %4 = tpu.iota {dimensions = array<i32: 0>} : vector<64x16xi32>
    %5 = tpu.iota {dimensions = array<i32: 1>} : vector<64x16xi32>
    %false = arith.constant false
    %6 = vector.broadcast %false : i1 to vector<64x16xi1>
    %c0_i32 = arith.constant 0 : i32
    %7 = vector.broadcast %c0_i32 : i32 to vector<64x16xi32>
    %8 = arith.cmpi eq, %4, %7 : vector<64x16xi32>
    %c0_4 = arith.constant 0 : index
    %c0_5 = arith.constant 0 : index
    %9 = memref.load %arg0[%c0_4, %c0_5] : memref<2x8xi32, #tpu.memory_space<smem>>
    %10 = vector.broadcast %9 : i32 to vector<64x16xi32>
    %11 = arith.cmpi eq, %5, %10 : vector<64x16xi32>
    %12 = arith.andi %8, %11 : vector<64x16xi1>
    %13 = arith.ori %6, %12 : vector<64x16xi1>
    %c1_i32 = arith.constant 1 : i32
    %14 = vector.broadcast %c1_i32 : i32 to vector<64x16xi32>
    %15 = arith.cmpi eq, %4, %14 : vector<64x16xi32>
    %c1 = arith.constant 1 : index
    %c0_6 = arith.constant 0 : index
    %16 = memref.load %arg0[%c1, %c0_6] : memref<2x8xi32, #tpu.memory_space<smem>>
    %17 = vector.broadcast %16 : i32 to vector<64x16xi32>
    %18 = arith.cmpi eq, %5, %17 : vector<64x16xi32>
    %19 = arith.andi %15, %18 : vector<64x16xi1>
    %20 = arith.ori %13, %19 : vector<64x16xi1>
    %c8_i32 = arith.constant 8 : i32
    %21 = vector.broadcast %c8_i32 : i32 to vector<64x16xi32>
    %22 = arith.cmpi eq, %4, %21 : vector<64x16xi32>
    %c0_7 = arith.constant 0 : index
    %c1_8 = arith.constant 1 : index
    %23 = memref.load %arg0[%c0_7, %c1_8] : memref<2x8xi32, #tpu.memory_space<smem>>
    %24 = vector.broadcast %23 : i32 to vector<64x16xi32>
    %25 = arith.cmpi eq, %5, %24 : vector<64x16xi32>
    %26 = arith.andi %22, %25 : vector<64x16xi1>
    %27 = arith.ori %20, %26 : vector<64x16xi1>
    %c9_i32 = arith.constant 9 : i32
    %28 = vector.broadcast %c9_i32 : i32 to vector<64x16xi32>
    %29 = arith.cmpi eq, %4, %28 : vector<64x16xi32>
    %c1_9 = arith.constant 1 : index
    %c1_10 = arith.constant 1 : index
    %30 = memref.load %arg0[%c1_9, %c1_10] : memref<2x8xi32, #tpu.memory_space<smem>>
    %31 = vector.broadcast %30 : i32 to vector<64x16xi32>
    %32 = arith.cmpi eq, %5, %31 : vector<64x16xi32>
    %33 = arith.andi %29, %32 : vector<64x16xi1>
    %34 = arith.ori %27, %33 : vector<64x16xi1>
    %c16_i32 = arith.constant 16 : i32
    %35 = vector.broadcast %c16_i32 : i32 to vector<64x16xi32>
    %36 = arith.cmpi eq, %4, %35 : vector<64x16xi32>
    %c0_11 = arith.constant 0 : index
    %c2 = arith.constant 2 : index
    %37 = memref.load %arg0[%c0_11, %c2] : memref<2x8xi32, #tpu.memory_space<smem>>
    %38 = vector.broadcast %37 : i32 to vector<64x16xi32>
    %39 = arith.cmpi eq, %5, %38 : vector<64x16xi32>
    %40 = arith.andi %36, %39 : vector<64x16xi1>
    %41 = arith.ori %34, %40 : vector<64x16xi1>
    %c17_i32 = arith.constant 17 : i32
    %42 = vector.broadcast %c17_i32 : i32 to vector<64x16xi32>
    %43 = arith.cmpi eq, %4, %42 : vector<64x16xi32>
    %c1_12 = arith.constant 1 : index
    %c2_13 = arith.constant 2 : index
    %44 = memref.load %arg0[%c1_12, %c2_13] : memref<2x8xi32, #tpu.memory_space<smem>>
    %45 = vector.broadcast %44 : i32 to vector<64x16xi32>
    %46 = arith.cmpi eq, %5, %45 : vector<64x16xi32>
    %47 = arith.andi %43, %46 : vector<64x16xi1>
    %48 = arith.ori %41, %47 : vector<64x16xi1>
    %c24_i32 = arith.constant 24 : i32
    %49 = vector.broadcast %c24_i32 : i32 to vector<64x16xi32>
    %50 = arith.cmpi eq, %4, %49 : vector<64x16xi32>
    %c0_14 = arith.constant 0 : index
    %c3 = arith.constant 3 : index
    %51 = memref.load %arg0[%c0_14, %c3] : memref<2x8xi32, #tpu.memory_space<smem>>
    %52 = vector.broadcast %51 : i32 to vector<64x16xi32>
    %53 = arith.cmpi eq, %5, %52 : vector<64x16xi32>
    %54 = arith.andi %50, %53 : vector<64x16xi1>
    %55 = arith.ori %48, %54 : vector<64x16xi1>
    %c25_i32 = arith.constant 25 : i32
    %56 = vector.broadcast %c25_i32 : i32 to vector<64x16xi32>
    %57 = arith.cmpi eq, %4, %56 : vector<64x16xi32>
    %c1_15 = arith.constant 1 : index
    %c3_16 = arith.constant 3 : index
    %58 = memref.load %arg0[%c1_15, %c3_16] : memref<2x8xi32, #tpu.memory_space<smem>>
    %59 = vector.broadcast %58 : i32 to vector<64x16xi32>
    %60 = arith.cmpi eq, %5, %59 : vector<64x16xi32>
    %61 = arith.andi %57, %60 : vector<64x16xi1>
    %62 = arith.ori %55, %61 : vector<64x16xi1>
    %c32_i32 = arith.constant 32 : i32
    %63 = vector.broadcast %c32_i32 : i32 to vector<64x16xi32>
    %64 = arith.cmpi eq, %4, %63 : vector<64x16xi32>
    %c0_17 = arith.constant 0 : index
    %c4 = arith.constant 4 : index
    %65 = memref.load %arg0[%c0_17, %c4] : memref<2x8xi32, #tpu.memory_space<smem>>
    %66 = vector.broadcast %65 : i32 to vector<64x16xi32>
    %67 = arith.cmpi eq, %5, %66 : vector<64x16xi32>
    %68 = arith.andi %64, %67 : vector<64x16xi1>
    %69 = arith.ori %62, %68 : vector<64x16xi1>
    %c33_i32 = arith.constant 33 : i32
    %70 = vector.broadcast %c33_i32 : i32 to vector<64x16xi32>
    %71 = arith.cmpi eq, %4, %70 : vector<64x16xi32>
    %c1_18 = arith.constant 1 : index
    %c4_19 = arith.constant 4 : index
    %72 = memref.load %arg0[%c1_18, %c4_19] : memref<2x8xi32, #tpu.memory_space<smem>>
    %73 = vector.broadcast %72 : i32 to vector<64x16xi32>
    %74 = arith.cmpi eq, %5, %73 : vector<64x16xi32>
    %75 = arith.andi %71, %74 : vector<64x16xi1>
    %76 = arith.ori %69, %75 : vector<64x16xi1>
    %c40_i32 = arith.constant 40 : i32
    %77 = vector.broadcast %c40_i32 : i32 to vector<64x16xi32>
    %78 = arith.cmpi eq, %4, %77 : vector<64x16xi32>
    %c0_20 = arith.constant 0 : index
    %c5 = arith.constant 5 : index
    %79 = memref.load %arg0[%c0_20, %c5] : memref<2x8xi32, #tpu.memory_space<smem>>
    %80 = vector.broadcast %79 : i32 to vector<64x16xi32>
    %81 = arith.cmpi eq, %5, %80 : vector<64x16xi32>
    %82 = arith.andi %78, %81 : vector<64x16xi1>
    %83 = arith.ori %76, %82 : vector<64x16xi1>
    %c41_i32 = arith.constant 41 : i32
    %84 = vector.broadcast %c41_i32 : i32 to vector<64x16xi32>
    %85 = arith.cmpi eq, %4, %84 : vector<64x16xi32>
    %c1_21 = arith.constant 1 : index
    %c5_22 = arith.constant 5 : index
    %86 = memref.load %arg0[%c1_21, %c5_22] : memref<2x8xi32, #tpu.memory_space<smem>>
    %87 = vector.broadcast %86 : i32 to vector<64x16xi32>
    %88 = arith.cmpi eq, %5, %87 : vector<64x16xi32>
    %89 = arith.andi %85, %88 : vector<64x16xi1>
    %90 = arith.ori %83, %89 : vector<64x16xi1>
    %c48_i32 = arith.constant 48 : i32
    %91 = vector.broadcast %c48_i32 : i32 to vector<64x16xi32>
    %92 = arith.cmpi eq, %4, %91 : vector<64x16xi32>
    %c0_23 = arith.constant 0 : index
    %c6 = arith.constant 6 : index
    %93 = memref.load %arg0[%c0_23, %c6] : memref<2x8xi32, #tpu.memory_space<smem>>
    %94 = vector.broadcast %93 : i32 to vector<64x16xi32>
    %95 = arith.cmpi eq, %5, %94 : vector<64x16xi32>
    %96 = arith.andi %92, %95 : vector<64x16xi1>
    %97 = arith.ori %90, %96 : vector<64x16xi1>
    %c49_i32 = arith.constant 49 : i32
    %98 = vector.broadcast %c49_i32 : i32 to vector<64x16xi32>
    %99 = arith.cmpi eq, %4, %98 : vector<64x16xi32>
    %c1_24 = arith.constant 1 : index
    %c6_25 = arith.constant 6 : index
    %100 = memref.load %arg0[%c1_24, %c6_25] : memref<2x8xi32, #tpu.memory_space<smem>>
    %101 = vector.broadcast %100 : i32 to vector<64x16xi32>
    %102 = arith.cmpi eq, %5, %101 : vector<64x16xi32>
    %103 = arith.andi %99, %102 : vector<64x16xi1>
    %104 = arith.ori %97, %103 : vector<64x16xi1>
    %c56_i32 = arith.constant 56 : i32
    %105 = vector.broadcast %c56_i32 : i32 to vector<64x16xi32>
    %106 = arith.cmpi eq, %4, %105 : vector<64x16xi32>
    %c0_26 = arith.constant 0 : index
    %c7 = arith.constant 7 : index
    %107 = memref.load %arg0[%c0_26, %c7] : memref<2x8xi32, #tpu.memory_space<smem>>
    %108 = vector.broadcast %107 : i32 to vector<64x16xi32>
    %109 = arith.cmpi eq, %5, %108 : vector<64x16xi32>
    %110 = arith.andi %106, %109 : vector<64x16xi1>
    %111 = arith.ori %104, %110 : vector<64x16xi1>
    %c57_i32 = arith.constant 57 : i32
    %112 = vector.broadcast %c57_i32 : i32 to vector<64x16xi32>
    %113 = arith.cmpi eq, %4, %112 : vector<64x16xi32>
    %c1_27 = arith.constant 1 : index
    %c7_28 = arith.constant 7 : index
    %114 = memref.load %arg0[%c1_27, %c7_28] : memref<2x8xi32, #tpu.memory_space<smem>>
    %115 = vector.broadcast %114 : i32 to vector<64x16xi32>
    %116 = arith.cmpi eq, %5, %115 : vector<64x16xi32>
    %117 = arith.andi %113, %116 : vector<64x16xi1>
    %118 = arith.ori %111, %117 : vector<64x16xi1>
    %119 = arith.extui %118 : vector<64x16xi1> to vector<64x16xi32>
    %120 = arith.sitofp %119 : vector<64x16xi32> to vector<64x16xf32>
    %cst = arith.constant dense<0.000000e+00> : vector<64x32xf32>
    %121 = tpu.matmul %120, %0, %cst {dimension_numbers = #tpu.dot_dimension_numbers<[1], [0], [0], [1], [0, 0, 1, 1], [], []>} : vector<64x16xf32>, vector<16x32xf32>, vector<64x32xf32> -> vector<64x32xf32>
    %cst_29 = arith.constant 0.000000e+00 : f32
    %122 = vector.broadcast %cst_29 : f32 to vector<8x32xf32>
    %123 = vector.extract_strided_slice %121 {offsets = [0, 0], sizes = [8, 32], strides = [1, 1]} : vector<64x32xf32> to vector<8x32xf32>
    %cst_30 = arith.constant dense<0.000000e+00> : vector<8x32xf32>
    %124 = tpu.matmul %122, %1, %cst_30 {dimension_numbers = #tpu.dot_dimension_numbers<[1], [0], [0], [1], [0, 0, 1, 1], [], []>} : vector<8x32xf32>, vector<32x32xf32>, vector<8x32xf32> -> vector<8x32xf32>
    %125 = arith.addf %124, %123 : vector<8x32xf32>
    %126 = math.tanh %125 : vector<8x32xf32>
    %127 = vector.extract_strided_slice %121 {offsets = [8, 0], sizes = [8, 32], strides = [1, 1]} : vector<64x32xf32> to vector<8x32xf32>
    %cst_31 = arith.constant dense<0.000000e+00> : vector<8x32xf32>
    %128 = tpu.matmul %126, %1, %cst_31 {dimension_numbers = #tpu.dot_dimension_numbers<[1], [0], [0], [1], [0, 0, 1, 1], [], []>} : vector<8x32xf32>, vector<32x32xf32>, vector<8x32xf32> -> vector<8x32xf32>
    %129 = arith.addf %128, %127 : vector<8x32xf32>
    %130 = math.tanh %129 : vector<8x32xf32>
    %131 = vector.extract_strided_slice %121 {offsets = [16, 0], sizes = [8, 32], strides = [1, 1]} : vector<64x32xf32> to vector<8x32xf32>
    %cst_32 = arith.constant dense<0.000000e+00> : vector<8x32xf32>
    %132 = tpu.matmul %130, %1, %cst_32 {dimension_numbers = #tpu.dot_dimension_numbers<[1], [0], [0], [1], [0, 0, 1, 1], [], []>} : vector<8x32xf32>, vector<32x32xf32>, vector<8x32xf32> -> vector<8x32xf32>
    %133 = arith.addf %132, %131 : vector<8x32xf32>
    %134 = math.tanh %133 : vector<8x32xf32>
    %135 = vector.extract_strided_slice %121 {offsets = [24, 0], sizes = [8, 32], strides = [1, 1]} : vector<64x32xf32> to vector<8x32xf32>
    %cst_33 = arith.constant dense<0.000000e+00> : vector<8x32xf32>
    %136 = tpu.matmul %134, %1, %cst_33 {dimension_numbers = #tpu.dot_dimension_numbers<[1], [0], [0], [1], [0, 0, 1, 1], [], []>} : vector<8x32xf32>, vector<32x32xf32>, vector<8x32xf32> -> vector<8x32xf32>
    %137 = arith.addf %136, %135 : vector<8x32xf32>
    %138 = math.tanh %137 : vector<8x32xf32>
    %139 = vector.extract_strided_slice %121 {offsets = [32, 0], sizes = [8, 32], strides = [1, 1]} : vector<64x32xf32> to vector<8x32xf32>
    %cst_34 = arith.constant dense<0.000000e+00> : vector<8x32xf32>
    %140 = tpu.matmul %138, %1, %cst_34 {dimension_numbers = #tpu.dot_dimension_numbers<[1], [0], [0], [1], [0, 0, 1, 1], [], []>} : vector<8x32xf32>, vector<32x32xf32>, vector<8x32xf32> -> vector<8x32xf32>
    %141 = arith.addf %140, %139 : vector<8x32xf32>
    %142 = math.tanh %141 : vector<8x32xf32>
    %143 = vector.extract_strided_slice %121 {offsets = [40, 0], sizes = [8, 32], strides = [1, 1]} : vector<64x32xf32> to vector<8x32xf32>
    %cst_35 = arith.constant dense<0.000000e+00> : vector<8x32xf32>
    %144 = tpu.matmul %142, %1, %cst_35 {dimension_numbers = #tpu.dot_dimension_numbers<[1], [0], [0], [1], [0, 0, 1, 1], [], []>} : vector<8x32xf32>, vector<32x32xf32>, vector<8x32xf32> -> vector<8x32xf32>
    %145 = arith.addf %144, %143 : vector<8x32xf32>
    %146 = math.tanh %145 : vector<8x32xf32>
    %147 = vector.extract_strided_slice %121 {offsets = [48, 0], sizes = [8, 32], strides = [1, 1]} : vector<64x32xf32> to vector<8x32xf32>
    %cst_36 = arith.constant dense<0.000000e+00> : vector<8x32xf32>
    %148 = tpu.matmul %146, %1, %cst_36 {dimension_numbers = #tpu.dot_dimension_numbers<[1], [0], [0], [1], [0, 0, 1, 1], [], []>} : vector<8x32xf32>, vector<32x32xf32>, vector<8x32xf32> -> vector<8x32xf32>
    %149 = arith.addf %148, %147 : vector<8x32xf32>
    %150 = math.tanh %149 : vector<8x32xf32>
    %151 = vector.extract_strided_slice %121 {offsets = [56, 0], sizes = [8, 32], strides = [1, 1]} : vector<64x32xf32> to vector<8x32xf32>
    %cst_37 = arith.constant dense<0.000000e+00> : vector<8x32xf32>
    %152 = tpu.matmul %150, %1, %cst_37 {dimension_numbers = #tpu.dot_dimension_numbers<[1], [0], [0], [1], [0, 0, 1, 1], [], []>} : vector<8x32xf32>, vector<32x32xf32>, vector<8x32xf32> -> vector<8x32xf32>
    %153 = arith.addf %152, %151 : vector<8x32xf32>
    %154 = math.tanh %153 : vector<8x32xf32>
    %cst_38 = arith.constant dense<0.000000e+00> : vector<8x128xf32>
    %155 = tpu.matmul %154, %2, %cst_38 {dimension_numbers = #tpu.dot_dimension_numbers<[1], [0], [0], [1], [0, 0, 1, 1], [], []>} : vector<8x32xf32>, vector<32x128xf32>, vector<8x128xf32> -> vector<8x128xf32>
    %156 = arith.addf %155, %3 : vector<8x128xf32>
    %c0_39 = arith.constant 0 : index
    %c0_40 = arith.constant 0 : index
    %157 = vector.load %arg2[%c0_39, %c0_40] : memref<8x128xf32, #tpu.memory_space<vmem>>, vector<8x128xf32>
    tpu.vector_store %arg2[%c0_39, %c0_40], %156 {strides = array<i32>} : memref<8x128xf32, #tpu.memory_space<vmem>>, vector<8x128xf32>,
    return
  }
}

</mosaic_0001>

<bundles_post_ra>
// kernel: tpu_custom_call.1
= control target key start
LH: loop header
LB: loop body
LE: loop exit
PB: predicated region body
PF: predicated region fallthrough
CT: control target
= control target key end

     0   :  { %7 = vsyncpa [#allocation5], 0  ;;  %s1850_s0 = inlined_call_operand.hbm [shape: s32[2,8], index: 0, kind: input, shape index: {}]   ;;  %s1851_s1 = inlined_call_operand.hbm [shape: f32[88,128], index: 1, kind: input, shape index: {}]   ;;  %s1852_s2 = inlined_call_operand.hbm [shape: f32[8,128], index: 2, kind: output, shape index: {}]  }
   0x1   :  { %8 = vsyncpa [#allocation3], 0 }
   0x2   :  { %9 = vsyncpa [#allocation4], 0  ;;  %s1603_s11 = scalar_lea.hbm %s1850_s0, 32 }
   0x3   :  { %p1604_p0 = scmp.ne.s32.totalorder %s1850_s0, %s1603_s11  ;;  %p1607_p1 = scmp.lt.u32.totalorder %s1603_s11, %s1850_s0 }
   0x5   :  { %p1609_p2 = pnand %p1607_p1, %p1604_p0 }
   0x7   :  { %1612 = shalt.err (!%p1609_p2)
}
   0x8   :  { %s1663_s16 = smov [#allocation2]   ;;  %s1664_s19 = smov [#allocation6]  }
   0x9   :  { %17 = dma.hbm_to_smem %s1850_s0, 32, %s1663_s16, [#allocation5]  }
   0xa   :  { %s23_s20 = sshll.u32 %s1664_s19, 4  ;;  %s1613_s23 = scalar_lea.hbm %s1851_s1, 1408  ;;  %s24_s20 = int_to_ptr.vmem [resolvable:$true] %s23_s20 }
   0xb   :  { %p1614_p3 = scmp.ne.s32.totalorder %s1851_s1, %s1613_s23  ;;  %p1617_p4 = scmp.lt.u32.totalorder %s1613_s23, %s1851_s1 }
   0xd   :  { %p1619_p5 = pnand %p1617_p4, %p1614_p3 }
   0xf   :  { %1622 = shalt.err (!%p1619_p5)
}
  0x10   :  { %s1623_s28 = scalar_lea.vmem %s24_s20, 1408  ;;  %p1628_p7 = scmp.lt.s32.totalorder %s24_s20, %s24_s20 }
  0x11   :  { %p1624_p6 = scmp.ne.s32.totalorder %s24_s20, %s1623_s28  ;;  %p1629_p8 = scmp.lt.s32.totalorder %s1623_s28, %s1623_s28 }
  0x13   :  { %p1630_p9 = por %p1629_p8, %p1628_p7 }
  0x15   :  { %p1631_p10 = pnand %p1630_p9, %p1624_p6 }
  0x17   :  { %1634 = shalt.err (!%p1631_p10)
}
  0x18   :  { %s1665_s0 = smov 128   ;;  %s1666_s29 = smov 8  }
  0x19   :  { %29 = dma.hbm_to_vmem [thread:$0]  %s1851_s1, 1408, %s24_s20, [#allocation3], %s1665_s0, %s1665_s0, %s1666_s29  }
  0x1a   :  { %1657 = dma.done.wait [#allocation5], 32  }
  0x1b   :  { %1658 = vsyncadd [#allocation5], 4294967264 }
  0x1c   :  { %1659 = dma.done.wait [#allocation3], 1408  }
  0x1d   :  { %1660 = vsyncadd [#allocation3], 4294965888 }
  0x1e   :  { %36 = sfence }
  0x1f   :  { %v39_v0 = vld [vmem:[#allocation6 + $0x10] sm:$0xff]  ;;  %v40_v1 = vld [vmem:[#allocation6 + $0x18] sm:$0xff]  ;;  %v37_v2 = vld [vmem:[#allocation6] sm:$0xff]  ;;  %v48_v3 = vlaneseq  ;;  %s67_s4 = sld [smem:[#allocation2]]  ;;  %v1667_v4 = vmov 0.0|0.0   ;;  %s1313_s1 = sld [smem:[#allocation2 + $0x1]] }
  0x20   :  { %1525 = vmatprep.subr.bf16.mxu1 %v1667_v4  ;;  %v1711_v5 = vpack.c.bf16 %v40_v1, %v39_v0  ;;  %v38_v6 = vld [vmem:[#allocation6 + $0x8] sm:$0xff]  ;;  %v41_v7 = vld [vmem:[#allocation6 + $0x20] sm:$0xff]  ;;  %s1312_s5 = sld [smem:[#allocation2 + $0x80]]  ;;  %s1314_s6 = sld [smem:[#allocation2 + $0x81]]  ;;  %vm1854_vm1 = vmmov 0   ;;  %v1669_v14 = vmov 0.0  }
  0x21   :  { %v42_v8 = vld [vmem:[#allocation6 + $0x28] sm:$0xff]  ;;  %v1521_v9 = vpack.c.bf16 %v38_v6, %v37_v2  ;;  %v1713_v10 = vshrl.u32 %v48_v3, 7  ;;  %v1718_v12 = vand.u32 127, %v48_v3  ;;  %1430 = vmatprep.mubr.msk.f32.mxu1 %vm1854_vm1, %v1669_v14  ;;  %vm499_vm8 = vcmask 130048   ;;  %s1315_s7 = sld [smem:[#allocation2 + $0x2]]  ;;  %s1317_s9 = sld [smem:[#allocation2 + $0x3]] }
  0x22   :  { %1527 = vmatpush3.bf16.msra.mxu1 %v1711_v5  ;;  %v1716_v11 = vpack.c.bf16 %v42_v8, %v41_v7  ;;  %s1316_s8 = sld [smem:[#allocation2 + $0x82]]  ;;  %s1318_s10 = sld [smem:[#allocation2 + $0x83]] }
  0x23   :  { %1522 = vmatprep.subr.bf16.mxu0 %v1521_v9  ;;  %1528 = vmatprep.subr.bf16.mxu1 %v1667_v4  ;;  %v50_v13 = vadd.s32 8, %v1713_v10  ;;  %vm59_vm0 = vcmp.eq.s32.totalorder %v1713_v10, 0  ;;  %vm78_vm2 = vcmp.eq.s32.totalorder %v1713_v10, 1  ;;  %v51_v21 = vadd.s32 16, %v1713_v10  ;;  %s1319_s11 = sld [smem:[#allocation2 + $0x4]]  ;;  %s1321_s13 = sld [smem:[#allocation2 + $0x5]] }
  0x24   :  { %1524 = vmatpush3.bf16.msra.mxu0 %v1521_v9  ;;  %s1320_s12 = sld [smem:[#allocation2 + $0x84]]  ;;  %s1762_s14 = sld [smem:[#allocation2 + $0x85]]  ;;  %v52_v31 = vadd.s32 24, %v1713_v10  ;;  %v53_v34 = vadd.s32 32, %v1713_v10  ;;  %v54_v37 = vadd.s32 40, %v1713_v10  ;;  %v55_v41 = vadd.s32 48, %v1713_v10 }
  0x25   :  { %v68_v15 = vstv %s67_s4  ;;  %1537 = vmatprep.subr.bf16.mxu0 %v1667_v4  ;;  %vm106_vm6 = vcmp.eq.s32.totalorder %v50_v13, 8  ;;  %v114_v17 = vstv %s1313_s1  ;;  %vm133_vm10 = vcmp.eq.s32.totalorder %v50_v13, 9  ;;  %s1767_s15 = sld [smem:[#allocation2 + $0x6]]  ;;  %s1772_s17 = sld [smem:[#allocation2 + $0x7]] }
  0x26   :  { %1530 = vmatpush3.bf16.msra.mxu1 %v1716_v11  ;;  %vm69_vm3 = vcmp.eq.s32.totalorder %v1718_v12, %v68_v15  ;;  %v87_v16 = vstv %s1312_s5  ;;  %v141_v18 = vstv %s1314_s6  ;;  %vm115_vm9 = vcmp.eq.s32.totalorder %v1718_v12, %v114_v17  ;;  %s1769_s16 = sld [smem:[#allocation2 + $0x86]]  ;;  %s1774_s18 = sld [smem:[#allocation2 + $0x87]] }
  0x27   :  { %vm70_vm4 = vmand %vm59_vm0, %vm69_vm3  ;;  %vm88_vm5 = vcmp.eq.s32.totalorder %v1718_v12, %v87_v16  ;;  %1531 = vmatprep.subr.bf16.mxu1 %v1667_v4  ;;  %vm142_vm11 = vcmp.eq.s32.totalorder %v1718_v12, %v141_v18  ;;  %vm161_vm0 = vcmp.eq.s32.totalorder %v51_v21, 16  ;;  %v168_v22 = vstv %s1315_s7  ;;  %s1670_s19 = smov [#allocation7]  }
  0x28   :  { %vm89_vm7 = vmand %vm78_vm2, %vm88_vm5  ;;  %vm188_vm2 = vcmp.eq.s32.totalorder %v51_v21, 17  ;;  %v195_v23 = vstv %s1316_s8  ;;  %vm169_vm3 = vcmp.eq.s32.totalorder %v1718_v12, %v168_v22  ;;  %v222_v32 = vstv %s1317_s9  ;;  %v44_v21 = vld [vmem:[#allocation6 + $0x38] sm:$0xff]  ;;  %s1302_s20 = sshll.u32 %s1670_s19, 4  ;;  %s1303_s20 = int_to_ptr.vmem [resolvable:$true] %s1302_s20 }
  0x29   :  { %vm97_vm12 = vmor %vm70_vm4, %vm89_vm7  ;;  %1431 = vmatmul.mubr.f32.vlgmr.msra.gmra.mrb[0].mxu1 %v1669_v14  ;;  %vm196_vm4 = vcmp.eq.s32.totalorder %v1718_v12, %v195_v23  ;;  %v249_v33 = vstv %s1318_s10  ;;  %v276_v35 = vstv %s1319_s11  ;;  %v330_v39 = vstv %s1321_s13  ;;  %v46_v23 = vld [vmem:[#allocation6 + $0x48] sm:$0xff]  ;;  %s1635_s21 = scalar_lea.vmem %s1303_s20, 128  ;;  %p1640_p12 = scmp.lt.s32.totalorder %s1303_s20, %s1303_s20 }
  0x2a   :  { %v1327_v19 = vsel %vm97_vm12, 1.0, %v1669_v14  ;;  %vm117_vm13 = vmand %vm106_vm6, %vm115_vm9  ;;  %1533 = vmatpush3.bf16.msra.mxu1 %v1711_v5  ;;  %1441 = vmatprep.mubr.msk.f32.mxu1 %vm1854_vm1, %v1669_v14  ;;  %vm1853_vm9 = vcmask 261120   ;;  %vm243_vm12 = vcmp.eq.s32.totalorder %v52_v31, 25  ;;  %v303_v36 = vstv %s1320_s12  ;;  %p1636_p11 = scmp.ne.s32.totalorder %s1303_s20, %s1635_s21  ;;  %p1641_p13 = scmp.lt.s32.totalorder %s1635_s21, %s1635_s21 }
  0x2b   :  { %1410 = vmatprep.mubr.msk.f32.mxu0 %vm499_vm8, %v1327_v19  ;;  %vm144_vm14 = vmand %vm133_vm10, %vm142_vm11  ;;  %1534 = vmatprep.subr.bf16.mxu1 %v1667_v4  ;;  %vm216_vm10 = vcmp.eq.s32.totalorder %v52_v31, 24  ;;  %vm223_vm11 = vcmp.eq.s32.totalorder %v1718_v12, %v222_v32  ;;  %v357_v40 = vstv %s1762_s14  ;;  %v384_v42 = vstv %s1767_s15 }
  0x2c   :  { %vm152_vm15 = vmor %vm117_vm13, %vm144_vm14  ;;  %vm250_vm13 = vcmp.eq.s32.totalorder %v1718_v12, %v249_v33  ;;  %v411_v43 = vstv %s1769_s16  ;;  %v56_v44 = vadd.s32 56, %v1713_v10  ;;  %v438_v46 = vstv %s1772_s17  ;;  %p1642_p0 = por %p1641_p13, %p1640_p12 }
  0x2d   :  { %v1328_v20 = vsel %vm152_vm15, 1.0, %v1669_v14  ;;  %vm172_vm5 = vmand %vm161_vm0, %vm169_vm3  ;;  %vm277_vm3 = vcmp.eq.s32.totalorder %v1718_v12, %v276_v35  ;;  %v465_v47 = vstv %s1774_s18 }
  0x2e   :  { %1411 = vmatmul.mubr.msk.f32.vlgmr.msra.gmra.mrb[0].mxu0 %vm499_vm8, %v1328_v20  ;;  %1536 = vmatpush3.bf16.msra.mxu1 %v1716_v11  ;;  %vm199_vm6 = vmand %vm188_vm2, %vm196_vm4  ;;  %vm271_vm2 = vcmp.eq.s32.totalorder %v53_v34, 32  ;;  %vm298_vm4 = vcmp.eq.s32.totalorder %v53_v34, 33  ;;  %v43_v20 = vld [vmem:[#allocation6 + $0x30] sm:$0xff]  ;;  %p1643_p1 = pnand %p1642_p0, %p1636_p11 }
  0x2f   :  { %1539 = vmatpush3.bf16.msra.mxu0 %v1711_v5  ;;  %1543 = vmatprep.subr.bf16.mxu1 %v1667_v4  ;;  %vm207_vm7 = vmor %vm172_vm5, %vm199_vm6  ;;  %vm304_vm5 = vcmp.eq.s32.totalorder %v1718_v12, %v303_v36  ;;  %v1574_v22 = vpack.c.bf16 %v44_v21, %v43_v20 }
  0x30   :  { %1540 = vmatprep.subr.bf16.mxu0 %v1667_v4  ;;  %v1329_v24 = vsel %vm207_vm7, 1.0, %v1669_v14  ;;  %vm227_vm14 = vmand %vm216_vm10, %vm223_vm11  ;;  %vm326_vm7 = vcmp.eq.s32.totalorder %v54_v37, 40  ;;  %vm331_vm11 = vcmp.eq.s32.totalorder %v1718_v12, %v330_v39 }
  0x31   :  { %1413 = vmatprep.mubr.msk.f32.mxu0 %vm499_vm8, %v1329_v24  ;;  %vm254_vm15 = vmand %vm243_vm12, %vm250_vm13  ;;  %vm353_vm12 = vcmp.eq.s32.totalorder %v54_v37, 41 }
  0x32   :  { %vm262_vm0 = vmor %vm227_vm14, %vm254_vm15  ;;  %vm358_vm14 = vcmp.eq.s32.totalorder %v1718_v12, %v357_v40 }
  0x33   :  { %1542 = vmatpush3.bf16.msra.mxu0 %v1716_v11  ;;  %v1330_v38 = vsel %vm262_vm0, 1.0, %v1669_v14  ;;  %vm282_vm6 = vmand %vm271_vm2, %vm277_vm3  ;;  %vm381_vm0 = vcmp.eq.s32.totalorder %v55_v41, 48  ;;  %vm385_vm2 = vcmp.eq.s32.totalorder %v1718_v12, %v384_v42 }
  0x34   :  { %1549 = vmatprep.subr.bf16.mxu0 %v1667_v4  ;;  %1414 = vmatmul.mubr.msk.f32.gmra.mrb[2].mxu0 %vm499_vm8, %v1330_v38  ;;  %vm309_vm10 = vmand %vm298_vm4, %vm304_vm5  ;;  %vm408_vm4 = vcmp.eq.s32.totalorder %v55_v41, 49  ;;  %vm412_vm5 = vcmp.eq.s32.totalorder %v1718_v12, %v411_v43 }
  0x35   :  { %vm317_vm13 = vmor %vm282_vm6, %vm309_vm10 }
  0x36   :  { %v1331_v45 = vsel %vm317_vm13, 1.0, %v1669_v14  ;;  %vm337_vm15 = vmand %vm326_vm7, %vm331_vm11  ;;  %vm463_vm11 = vcmp.eq.s32.totalorder %v56_v44, 57  ;;  %vm466_vm13 = vcmp.eq.s32.totalorder %v1718_v12, %v465_v47 }
  0x37   :  { %1416 = vmatprep.mubr.msk.f32.mxu0 %vm499_vm8, %v1331_v45  ;;  %vm364_vm3 = vmand %vm353_vm12, %vm358_vm14 }
  0x38   :  { %vm372_vm6 = vmor %vm337_vm15, %vm364_vm3 }
  0x39   :  { %v1332_v48 = vsel %vm372_vm6, 1.0, %v1669_v14  ;;  %vm392_vm10 = vmand %vm381_vm0, %vm385_vm2  ;;  %vm1856_vm0 = vmmov 0   ;;  %vm1857_vm2 = vcmask 261120  }
  0x3a   :  { %1417 = vmatmul.mubr.msk.f32.gmra.mrb[4].mxu0 %vm499_vm8, %v1332_v48  ;;  %vm419_vm7 = vmand %vm408_vm4, %vm412_vm5 }
  0x3b   :  { %vm427_vm12 = vmor %vm392_vm10, %vm419_vm7 }
  0x3c   :  { %v1333_v49 = vsel %vm427_vm12, 1.0, %v1669_v14  ;;  %vm474_vm15 = vmand %vm463_vm11, %vm466_vm13 }
  0x3d   :  { %1419 = vmatprep.mubr.msk.f32.mxu0 %vm499_vm8, %v1333_v49 }
  0xfc   :  { %v699_v25 = vpop.f32.mrb[0].mxu1 }
  0xfd   :  { %v1432_v26 = vpop.f32.mrb[1].mxu1 }
 0x101   :  { %v1753_v27 = vpop.f32.mrb[0].mxu0 }
 0x102   :  { %v590_v28 = vpop.f32.mrb[1].mxu0 }
 0x103   :  { %v700_v29 = vadd.f32 %v699_v25, %v590_v28  ;;  %v47_v28 = vld [vmem:[#allocation6 + $0x50] sm:$0xff] }
 0x105   :  { %1587 = vtanh.f32 %v700_v29 }
 0x107   :  { %v1415_v55 = vpop.f32.mrb[2].mxu0 }
 0x108   :  { %v600_v56 = vpop.f32.mrb[3].mxu0 }
 0x10d   :  { %v1418_v57 = vpop.f32.mrb[4].mxu0 }
 0x10e   :  { %v610_v58 = vpop.f32.mrb[5].mxu0 }
 0x10f   :  { %v1588_v30 = vpop.eup %1587 }
 0x110   :  { %1442 = vmatmul.mubr.msk.f32.vlgmr.msra.gmra.mrb[2].mxu1 %vm1853_vm9, %v1588_v30  ;;  %vm436_vm9 = vcmp.eq.s32.totalorder %v56_v44, 56 }
 0x111   :  { %1545 = vmatpush3.bf16.msra.mxu1 %v1711_v5  ;;  %1463 = vmatprep.mubr.msk.f32.mxu1 %vm1854_vm1, %v1669_v14  ;;  %vm439_vm1 = vcmp.eq.s32.totalorder %v1718_v12, %v438_v46 }
 0x112   :  { %1546 = vmatprep.subr.bf16.mxu1 %v1667_v4  ;;  %vm447_vm14 = vmand %vm436_vm9, %vm439_vm1 }
 0x113   :  { %vm482_vm3 = vmor %vm447_vm14, %vm474_vm15 }
 0x114   :  { %v1334_v50 = vsel %vm482_vm3, 1.0, %v1669_v14  ;;  %vm1858_vm1 = vmmov %vm1857_vm2 }
 0x115   :  { %1548 = vmatpush3.bf16.msra.mxu1 %v1716_v11  ;;  %1420 = vmatmul.mubr.msk.f32.gmra.mrb[6].mxu0 %vm499_vm8, %v1334_v50  ;;  %vm1859_vm8 = vmmov %vm1858_vm1 }
 0x116   :  { %1555 = vmatprep.subr.bf16.mxu1 %v1667_v4  ;;  %1452 = vmatprep.mubr.msk.f32.mxu0 %vm1856_vm0, %v1669_v14  ;;  %vm1860_vm9 = vmmov %vm1858_vm1 }
 0x117   :  { %vm1861_vm4 = vmmov %vm1858_vm1 }
 0x118   :  { %vm1862_vm5 = vmmov %vm1858_vm1 }
 0x119   :  { %vm1863_vm6 = vmmov %vm1858_vm1 }
 0x1e3   :  { %v773_v51 = vpop.f32.mrb[2].mxu1 }
 0x1e4   :  { %v774_v52 = vadd.f32 %v1753_v27, %v773_v51  ;;  %v1443_v53 = vpop.f32.mrb[3].mxu1 }
 0x1e6   :  { %1589 = vtanh.f32 %v774_v52 }
 0x1e8   :  { %v1421_v59 = vpop.f32.mrb[6].mxu0 }
 0x1e9   :  { %v620_v60 = vpop.f32.mrb[7].mxu0 }
 0x1f0   :  { %v1590_v54 = vpop.eup %1589 }
 0x1f1   :  { %1453 = vmatmul.mubr.msk.f32.vlgmr.msra.gmra.mrb[8].mxu0 %vm1857_vm2, %v1590_v54 }
 0x1f2   :  { %1551 = vmatpush3.bf16.msra.mxu0 %v1711_v5  ;;  %1474 = vmatprep.mubr.msk.f32.mxu0 %vm1856_vm0, %v1669_v14 }
 0x1f3   :  { %1552 = vmatprep.subr.bf16.mxu0 %v1667_v4 }
 0x1f6   :  { %1554 = vmatpush3.bf16.msra.mxu0 %v1716_v11 }
 0x1f7   :  { %1561 = vmatprep.subr.bf16.mxu0 %v1667_v4 }
 0x2c4   :  { %v847_v61 = vpop.f32.mrb[8].mxu0 }
 0x2c5   :  { %v848_v62 = vadd.f32 %v847_v61, %v600_v56  ;;  %v1454_v63 = vpop.f32.mrb[9].mxu0 }
 0x2c7   :  { %1591 = vtanh.f32 %v848_v62 }
 0x2d1   :  { %v1592_v0 = vpop.eup %1591 }
 0x2d2   :  { %1464 = vmatmul.mubr.msk.f32.vlgmr.msra.gmra.mrb[4].mxu1 %vm1858_vm1, %v1592_v0 }
 0x2d3   :  { %1557 = vmatpush3.bf16.msra.mxu1 %v1711_v5  ;;  %1485 = vmatprep.mubr.msk.f32.mxu1 %vm1856_vm0, %v1669_v14 }
 0x2d4   :  { %1558 = vmatprep.subr.bf16.mxu1 %v1667_v4 }
 0x2d7   :  { %1560 = vmatpush3.bf16.msra.mxu1 %v1716_v11 }
 0x2d8   :  { %1567 = vmatprep.subr.bf16.mxu1 %v1667_v4 }
 0x3a5   :  { %v921_v1 = vpop.f32.mrb[4].mxu1 }
 0x3a6   :  { %v922_v2 = vadd.f32 %v1415_v55, %v921_v1  ;;  %v1465_v3 = vpop.f32.mrb[5].mxu1 }
 0x3a8   :  { %1593 = vtanh.f32 %v922_v2 }
 0x3b2   :  { %v1594_v6 = vpop.eup %1593 }
 0x3b3   :  { %1475 = vmatmul.mubr.msk.f32.vlgmr.msra.gmra.mrb[10].mxu0 %vm1859_vm8, %v1594_v6 }
 0x3b4   :  { %1563 = vmatpush3.bf16.msra.mxu0 %v1711_v5  ;;  %1496 = vmatprep.mubr.msk.f32.mxu0 %vm1856_vm0, %v1669_v14 }
 0x3b5   :  { %1564 = vmatprep.subr.bf16.mxu0 %v1667_v4 }
 0x3b8   :  { %1566 = vmatpush3.bf16.msra.mxu0 %v1716_v11 }
 0x3b9   :  { %1573 = vmatprep.subr.bf16.mxu0 %v1667_v4 }
 0x486   :  { %v995_v7 = vpop.f32.mrb[10].mxu0 }
 0x487   :  { %v996_v8 = vadd.f32 %v995_v7, %v610_v58  ;;  %v1476_v9 = vpop.f32.mrb[11].mxu0 }
 0x489   :  { %1595 = vtanh.f32 %v996_v8 }
 0x493   :  { %v1596_v10 = vpop.eup %1595 }
 0x494   :  { %1486 = vmatmul.mubr.msk.f32.vlgmr.msra.gmra.mrb[6].mxu1 %vm1860_vm9, %v1596_v10 }
 0x495   :  { %1569 = vmatpush3.bf16.msra.mxu1 %v1711_v5  ;;  %1507 = vmatprep.mubr.msk.f32.mxu1 %vm1856_vm0, %v1669_v14 }
 0x496   :  { %1570 = vmatprep.subr.bf16.mxu1 %v1667_v4 }
 0x499   :  { %1572 = vmatpush3.bf16.msra.mxu1 %v1716_v11  ;;  %v45_v11 = vld [vmem:[#allocation6 + $0x40] sm:$0xff] }
 0x49a   :  { %v1577_v24 = vpack.c.bf16 %v46_v23, %v45_v11 }
 0x567   :  { %v1069_v12 = vpop.f32.mrb[6].mxu1 }
 0x568   :  { %v1070_v13 = vadd.f32 %v1418_v57, %v1069_v12  ;;  %v1487_v15 = vpop.f32.mrb[7].mxu1 }
 0x56a   :  { %1597 = vtanh.f32 %v1070_v13 }
 0x574   :  { %v1598_v16 = vpop.eup %1597 }
 0x575   :  { %1497 = vmatmul.mubr.msk.f32.vlgmr.msra.gmra.mrb[12].mxu0 %vm1861_vm4, %v1598_v16 }
 0x576   :  { %1518 = vmatprep.mubr.msk.f32.mxu0 %vm1856_vm0, %v1669_v14  ;;  %1575 = vmatpush3.bf16.msra.mxu0 %v1574_v22 }
 0x577   :  { %1576 = vmatprep.subr.bf16.mxu0 %v1667_v4 }
 0x57a   :  { %1578 = vmatpush3.bf16.msra.mxu0 %v1577_v24 }
 0x648   :  { %v1143_v17 = vpop.f32.mrb[12].mxu0 }
 0x649   :  { %v1144_v18 = vadd.f32 %v1143_v17, %v620_v60  ;;  %v1498_v5 = vpop.f32.mrb[13].mxu0 }
 0x64b   :  { %1599 = vtanh.f32 %v1144_v18 }
 0x655   :  { %v1600_v19 = vpop.eup %1599 }
 0x656   :  { %1508 = vmatmul.mubr.msk.f32.vlgmr.msra.gmra.mrb[8].mxu1 %vm1862_vm5, %v1600_v19 }
 0x729   :  { %v1217_v25 = vpop.f32.mrb[8].mxu1 }
 0x72a   :  { %v1218_v26 = vadd.f32 %v1421_v59, %v1217_v25  ;;  %v1509_v14 = vpop.f32.mrb[9].mxu1 }
 0x72c   :  { %1601 = vtanh.f32 %v1218_v26 }
 0x736   :  { %v1602_v27 = vpop.eup %1601 }
 0x737   :  { %1519 = vmatmul.mubr.msk.f32.vlgmr.msra.gmra.mrb[14].mxu0 %vm1863_vm6, %v1602_v27 }
 0x80a   :  { %v1291_v29 = vpop.f32.mrb[14].mxu0 }
 0x80b   :  { %v1292_v30 = vadd.f32 %v1291_v29, %v47_v28  ;;  %v1520_v31 = vpop.f32.mrb[15].mxu0 }
 0x80d   :  { %1295 = vst [vmem:[#allocation7] sm:$0xff] %v1292_v30 }
 0x80e   :  { %1646 = shalt.err (!%p1643_p1)
}
 0x80f   :  { %s1647_s24 = scalar_lea.hbm %s1852_s2, 128 }
 0x810   :  { %p1648_p2 = scmp.ne.s32.totalorder %s1852_s2, %s1647_s24  ;;  %p1651_p3 = scmp.lt.u32.totalorder %s1647_s24, %s1852_s2 }
 0x812   :  { %p1653_p4 = pnand %p1651_p3, %p1648_p2 }
 0x814   :  { %1656 = shalt.err (!%p1653_p4)
}
 0x815   :  { %1305 = dma.vmem_to_hbm [thread:$0]  %s1303_s20, 128, %s1852_s2, [#allocation4]  }
 0x816   :  { %1661 = dma.done.wait [#allocation4], 128  }
 0x817   :  { %1662 = vsyncadd [#allocation4], 4294967168 }
 0x818   :  { %1309 = vsyncpa [#allocation3], 1 }
 0x819   :  { %1310 = vsyncpa [#allocation4], 1 }
 0x81a   :  { %1311 = vsyncpa [#allocation5], 1 }

</bundles_post_ra>
